<compile_context>
chip_gen: v7x
topology: tpu7x:2x2x1
jax: 0.10.0
libtpu: 0.0.40
codegen_flags: <defaults>
</compile_context>

<pallas_src>
import math

import jax
import jax.numpy as jnp
from jax import lax
from jax.experimental import pallas as pl
from jax.experimental.pallas import tpu as pltpu


def _round_up(x, m):
    return ((x + m - 1) // m) * m


def _make_dme_kernel(tile_m, valid_rows, need_row_mask):
    """Builds the per-block kernel.

    x_ref, y_ref: (tile_m, tile_n) VMEM tiles (native dtype).
    o_ref:        (1, tile_n) f32 per-step partial (column sums of (x-y)^2).
    """

    def kernel(x_ref, y_ref, o_ref):
        d = x_ref[...].astype(jnp.float32) - y_ref[...].astype(jnp.float32)
        if need_row_mask:
            # Rows past `valid_rows` in the last grid block are out-of-bounds
            # garbage; zero them before squaring.  Static flag: only emitted
            # when the grid does not divide the row count.
            row0 = pl.program_id(0) * tile_m
            rows = lax.broadcasted_iota(jnp.int32, d.shape, 0) + row0
            d = jnp.where(rows < valid_rows, d, 0.0)
        o_ref[...] = jnp.sum(d * d, axis=0, keepdims=True)

    return kernel


def dme_loss(estimated_density_map, gt_map, *, tile_n=512,
             block_bytes=2 * 1024 * 1024):
    assert estimated_density_map.shape == gt_map.shape
    B = estimated_density_map.shape[0]
    T = math.prod(estimated_density_map.shape)          # total element count
    itemsize = jnp.dtype(estimated_density_map.dtype).itemsize

    # Flat view (free bitcast for contiguous arrays).
    x = estimated_density_map.reshape(-1)
    y = gt_map.reshape(-1)

    # Pad the lane axis only (at most tile_n - 1 zeros; skipped when aligned).
    T_pad = _round_up(T, tile_n)
    if T_pad != T:
        x = jnp.pad(x, (0, T_pad - T))
        y = jnp.pad(y, (0, T_pad - T))
    R = T_pad // tile_n
    x = x.reshape(R, tile_n)
    y = y.reshape(R, tile_n)

    # Rows per block: ~block_bytes of the *input* dtype, multiple of 8
    # sublanes; collapse to the full row count for small problems.
    tile_m = max(8, (block_bytes // (itemsize * tile_n)) // 8 * 8)
    if R <= tile_m:
        tile_m = R                     # block dim == full array dim is legal
        need_row_mask = False
    else:
        need_row_mask = (R % tile_m) != 0
    grid = pl.cdiv(R, tile_m)

    partials = pl.pallas_call(
        _make_dme_kernel(tile_m, R, need_row_mask),
        out_shape=jax.ShapeDtypeStruct((grid, tile_n), jnp.float32),
        grid_spec=pltpu.PrefetchScalarGridSpec(
            num_scalar_prefetch=0,
            grid=(grid,),
            in_specs=[
                pl.BlockSpec((tile_m, tile_n), lambda i: (i, 0)),
                pl.BlockSpec((tile_m, tile_n), lambda i: (i, 0)),
            ],
            # Each grid step writes its own lane-dense (1, tile_n) partial
            # row -> no loop-carried accumulator, axis stays "parallel".
            out_specs=pl.BlockSpec((1, tile_n), lambda i: (i, 0)),
        ),
        compiler_params=pltpu.CompilerParams(
            dimension_semantics=("parallel",),
        ),
        cost_estimate=pl.CostEstimate(
            flops=3 * T_pad,
            transcendentals=0,
            bytes_accessed=2 * T_pad * itemsize + grid * tile_n * 4,
        ),
    )(x, y)

    # mean over batch of per-sample sums == total_sum / B; then divide by 2.
    return jnp.sum(partials) / (2.0 * B)


def _reference(est, gt):
    return jnp.mean(jnp.sum((est - gt) ** 2, axis=(1, 2, 3))) / 2.0


if __name__ == "__main__":
    key = jax.random.PRNGKey(0)
    k1, k2, k3, k4, k5, k6 = jax.random.split(key, 6)

    # 1) Main test shape: single-block fast path (R <= tile_m, no pad).
    B, C, H, W = 2, 4, 16, 16
    est = jax.random.normal(k1, (B, C, H, W), dtype=jnp.float32)
    gt = jax.random.normal(k2, (B, C, H, W), dtype=jnp.float32)
    loss = jax.block_until_ready(dme_loss(est, gt))
    ref = _reference(est, gt)
    assert jnp.allclose(loss, ref, rtol=1e-5, atol=1e-5), (loss, ref)

    # 2) Unaligned element count: exercises the lane-pad path.
    est2 = jax.random.normal(k3, (2, 3, 11, 13), dtype=jnp.float32)
    gt2 = jax.random.normal(k4, (2, 3, 11, 13), dtype=jnp.float32)
    loss2 = jax.block_until_ready(dme_loss(est2, gt2))
    ref2 = _reference(est2, gt2)
    assert jnp.allclose(loss2, ref2, rtol=1e-5, atol=1e-5), (loss2, ref2)

    # 3) Multi-block grid with row overhang: exercises the in-kernel row mask
    #    (small block budget forces grid > 1 and R % tile_m != 0).
    est3 = jax.random.normal(k5, (2, 4, 24, 24), dtype=jnp.float32)
    gt3 = jax.random.normal(k6, (2, 4, 24, 24), dtype=jnp.float32)
    loss3 = jax.block_until_ready(
        dme_loss(est3, gt3, tile_n=128, block_bytes=8 * 128 * 4))
    ref3 = _reference(est3, gt3)
    assert jnp.allclose(loss3, ref3, rtol=1e-5, atol=1e-5), (loss3, ref3)

    print("KERNEL_OK")
</pallas_src>

<mosaic_0001>
module attributes {stable_mosaic.version = 11 : i64} {
  func.func @kernel(%arg0: i32, %arg1: memref<4x512xf32, #tpu.memory_space<vmem>>, %arg2: memref<4x512xf32, #tpu.memory_space<vmem>>, %arg3: memref<1x512xf32, #tpu.memory_space<vmem>>) attributes {dimension_semantics = [#tpu.dimension_semantics<parallel>], iteration_bounds = array<i64: 1>, scalar_prefetch = 0 : i64, scratch_operands = 0 : i64, tpu.core_type = #tpu.core_type<tc>, window_params = [{transform_indices = @transform_0, window_bounds = array<i64: 4, 512>}, {transform_indices = @transform_1, window_bounds = array<i64: 4, 512>}, {transform_indices = @transform_2, window_bounds = array<i64: 1, 512>}]} {
    %c0 = arith.constant 0 : index
    %c0_0 = arith.constant 0 : index
    %0 = vector.load %arg1[%c0, %c0_0] : memref<4x512xf32, #tpu.memory_space<vmem>>, vector<4x512xf32>
    %c0_1 = arith.constant 0 : index
    %c0_2 = arith.constant 0 : index
    %1 = vector.load %arg2[%c0_1, %c0_2] : memref<4x512xf32, #tpu.memory_space<vmem>>, vector<4x512xf32>
    %2 = arith.subf %0, %1 : vector<4x512xf32>
    %3 = arith.mulf %2, %2 : vector<4x512xf32>
    %cst = arith.constant dense<0.000000e+00> : vector<512xf32>
    %4 = vector.multi_reduction <add>, %3, %cst [0] : vector<4x512xf32> to vector<512xf32>
    %5 = vector.shape_cast %4 : vector<512xf32> to vector<1x512xf32>
    %c0_3 = arith.constant 0 : index
    %c0_4 = arith.constant 0 : index
    %6 = vector.load %arg3[%c0_3, %c0_4] : memref<1x512xf32, #tpu.memory_space<vmem>>, vector<1x512xf32>
    tpu.vector_store %arg3[%c0_3, %c0_4], %5 {strides = array<i32>} : memref<1x512xf32, #tpu.memory_space<vmem>>, vector<1x512xf32>,
    return
  }
  func.func @transform_0(%arg0: i32) -> (i32, i32) {
    %c0_i32 = arith.constant 0 : i32
    %c0_i32_0 = arith.constant 0 : i32
    return %arg0, %c0_i32 : i32, i32
  }
  func.func @transform_1(%arg0: i32) -> (i32, i32) {
    %c0_i32 = arith.constant 0 : i32
    %c0_i32_0 = arith.constant 0 : i32
    return %arg0, %c0_i32 : i32, i32
  }
  func.func @transform_2(%arg0: i32) -> (i32, i32) {
    %c0_i32 = arith.constant 0 : i32
    %c0_i32_0 = arith.constant 0 : i32
    return %arg0, %c0_i32 : i32, i32
  }
}

</mosaic_0001>

<bundles_post_ra>
// kernel: tpu_custom_call.1
= control target key start
LH: loop header
LB: loop body
LE: loop exit
PB: predicated region body
PF: predicated region fallthrough
CT: control target
= control target key end

     0   :  { %7 = vsyncpa [#allocation3], 0  ;;  %s260_s0 = inlined_call_operand.hbm [shape: f32[4,512], index: 0, kind: input, shape index: {}]   ;;  %s261_s1 = inlined_call_operand.hbm [shape: f32[4,512], index: 1, kind: input, shape index: {}]   ;;  %s262_s2 = inlined_call_operand.hbm [shape: f32[1,512], index: 2, kind: output, shape index: {}]  }
   0x1   :  { %8 = vsyncpa [#allocation6], 0 }
   0x2   :  { %9 = vsyncpa [#allocation4], 0  ;;  %s205_s9 = smov [#allocation2]   ;;  %s206_s11 = smov [#allocation5]  }
   0x3   :  { %s16_s10 = sshll.u32 %s205_s9, 4  ;;  %s26_s12 = sshll.u32 %s206_s11, 4  ;;  %s17_s10 = int_to_ptr.vmem [resolvable:$true] %s16_s10  ;;  %s27_s12 = int_to_ptr.vmem [resolvable:$true] %s26_s12 }
   0x4   :  { %s133_s15 = scalar_lea.hbm %s260_s0, 256 }
   0x5   :  { %p134_p0 = scmp.ne.s32.totalorder %s260_s0, %s133_s15  ;;  %p137_p1 = scmp.lt.u32.totalorder %s133_s15, %s260_s0 }
   0x7   :  { %p139_p2 = pnand %p137_p1, %p134_p0 }
   0x9   :  { %142 = shalt.err (!%p139_p2)
}
   0xa   :  { %s143_s20 = scalar_lea.vmem %s17_s10, 256  ;;  %p148_p4 = scmp.lt.s32.totalorder %s17_s10, %s17_s10 }
   0xb   :  { %p144_p3 = scmp.ne.s32.totalorder %s17_s10, %s143_s20  ;;  %p149_p5 = scmp.lt.s32.totalorder %s143_s20, %s143_s20 }
   0xd   :  { %p150_p6 = por %p149_p5, %p148_p4 }
   0xf   :  { %p151_p7 = pnand %p150_p6, %p144_p3 }
  0x11   :  { %154 = shalt.err (!%p151_p7)
}
  0x12   :  { %19 = dma.hbm_to_vmem [thread:$0]  %s260_s0, 256, %s17_s10, [#allocation3]  }
  0x13   :  { %s155_s25 = scalar_lea.hbm %s261_s1, 256 }
  0x14   :  { %p156_p8 = scmp.ne.s32.totalorder %s261_s1, %s155_s25  ;;  %p159_p9 = scmp.lt.u32.totalorder %s155_s25, %s261_s1 }
  0x16   :  { %p161_p10 = pnand %p159_p9, %p156_p8 }
  0x18   :  { %164 = shalt.err (!%p161_p10)
}
  0x19   :  { %s165_s30 = scalar_lea.vmem %s27_s12, 256  ;;  %p170_p12 = scmp.lt.s32.totalorder %s27_s12, %s27_s12 }
  0x1a   :  { %p166_p11 = scmp.ne.s32.totalorder %s27_s12, %s165_s30  ;;  %p171_p13 = scmp.lt.s32.totalorder %s165_s30, %s165_s30 }
  0x1c   :  { %p172_p0 = por %p171_p13, %p170_p12 }
  0x1e   :  { %p173_p1 = pnand %p172_p0, %p166_p11 }
  0x20   :  { %176 = shalt.err (!%p173_p1)
}
  0x21   :  { %29 = dma.hbm_to_vmem [thread:$0]  %s261_s1, 256, %s27_s12, [#allocation6]  }
  0x22   :  { %199 = dma.done.wait [#allocation3], 256  }
  0x23   :  { %200 = vsyncadd [#allocation3], 4294967040 }
  0x24   :  { %201 = dma.done.wait [#allocation6], 256  }
  0x25   :  { %202 = vsyncadd [#allocation6], 4294967040  ;;  %v36_v0 = vld [vmem:[#allocation2] sm:$0xff]  ;;  %v37_v1 = vld [vmem:[#allocation2 + $0x8] sm:$0xff]  ;;  %vm50_vm0 = vcmask 1043456   ;;  %v88_v24 = vlaneseq  ;;  %s208_s1 = smov [#allocation7]  }
  0x26   :  { %v38_v2 = vld [vmem:[#allocation5] sm:$0xff]  ;;  %v39_v3 = vld [vmem:[#allocation5 + $0x8] sm:$0xff]  ;;  %v207_v22 = vmov 1966171168   ;;  %s119_s4 = sshll.u32 %s208_s1, 4  ;;  %s120_s4 = int_to_ptr.vmem [resolvable:$true] %s119_s4 }
  0x27   :  { %v40_v4 = vsub.f32 %v36_v0, %v38_v2  ;;  %v41_v5 = vsub.f32 %v37_v1, %v39_v3  ;;  %v86_v23 = vunpack.c.l.s4 %v207_v22  ;;  %v89_v34 = vshrl.u32 %v88_v24, 7  ;;  %s177_s5 = scalar_lea.vmem %s120_s4, 64  ;;  %p182_p3 = scmp.lt.s32.totalorder %s120_s4, %s120_s4 }
  0x28   :  { %vm110_vm1 = vcmp.lt.s32.totalorder %v88_v24, 512  ;;  %p178_p2 = scmp.ne.s32.totalorder %s120_s4, %s177_s5  ;;  %p183_p4 = scmp.lt.s32.totalorder %s177_s5, %s177_s5 }
  0x29   :  { %v42_v6 = vmul.f32 %v40_v4, %v40_v4  ;;  %v43_v7 = vmul.f32 %v41_v5, %v41_v5  ;;  %v87_v33 = vunpack.c.0.s8 %v86_v23 }
  0x2a   :  { %p184_p5 = por %p183_p4, %p182_p3 }
  0x2b   :  { %v46_v8 = vcombine.high %v42_v6, %v42_v6  ;;  %v51_v9 = vsel %vm50_vm0, %v42_v6, 0.0  ;;  %v47_v10 = vcombine.high %v43_v7, %v43_v7  ;;  %v65_v12 = vsel %vm50_vm0, %v43_v7, 0.0 }
  0x2c   :  { %v52_v11 = vrot.slane %v51_v9, 4  ;;  %v66_v14 = vrot.slane %v65_v12, 4  ;;  %v90_v42 = vsub.s32 %v87_v33, %v89_v34  ;;  %p185_p6 = pnand %p184_p5, %p178_p2 }
  0x2d   :  { %v58_v13 = vsel %vm50_vm0, %v46_v8, 0.0  ;;  %v72_v17 = vsel %vm50_vm0, %v47_v10, 0.0 }
  0x2e   :  { %v53_v15 = vadd.f32 %v52_v11, %v51_v9  ;;  %v59_v16 = vrot.slane %v58_v13, 4  ;;  %v67_v18 = vadd.f32 %v66_v14, %v65_v12  ;;  %v73_v19 = vrot.slane %v72_v17, 4 }
  0x30   :  { %v54_v20 = vrot.slane %v53_v15, 2  ;;  %v60_v21 = vadd.f32 %v59_v16, %v58_v13  ;;  %v68_v25 = vrot.slane %v67_v18, 2  ;;  %v74_v26 = vadd.f32 %v73_v19, %v72_v17 }
  0x32   :  { %v55_v27 = vadd.f32 %v54_v20, %v53_v15  ;;  %v61_v28 = vrot.slane %v60_v21, 2  ;;  %v69_v29 = vadd.f32 %v68_v25, %v67_v18  ;;  %v75_v30 = vrot.slane %v74_v26, 2 }
  0x34   :  { %v56_v31 = vrot.slane %v55_v27, 1  ;;  %v62_v32 = vadd.f32 %v61_v28, %v60_v21  ;;  %v70_v35 = vrot.slane %v69_v29, 1  ;;  %v76_v36 = vadd.f32 %v75_v30, %v74_v26 }
  0x36   :  { %v57_v37 = vadd.f32 %v56_v31, %v55_v27  ;;  %v63_v38 = vrot.slane %v62_v32, 1  ;;  %v71_v39 = vadd.f32 %v70_v35, %v69_v29  ;;  %v77_v40 = vrot.slane %v76_v36, 1 }
  0x38   :  { %v64_v41 = vadd.f32 %v63_v38, %v62_v32  ;;  %v78_v43 = vadd.f32 %v77_v40, %v76_v36 }
  0x3a   :  { %v83_v44 = vcombine.low %v57_v37, %v64_v41  ;;  %v84_v45 = vcombine.low %v71_v39, %v78_v43 }
  0x3c   :  { %v91_v46 = vrot.slane %v83_v44, %v90_v42  ;;  %v98_v47 = vrot.slane %v84_v45, %v90_v42 }
  0x3e   :  { %v99_v48 = vcombine.low %v91_v46, %v98_v47 }
  0x40   :  { %v106_v49 = vrot.slane %v99_v48, %v90_v42 }
  0x42   :  { %112 = vst.msk [vmem:[#allocation7] sm:$0xf] %vm110_vm1, %v106_v49 }
  0x43   :  { %188 = shalt.err (!%p185_p6)
}
  0x44   :  { %s189_s8 = scalar_lea.hbm %s262_s2, 64 }
  0x45   :  { %p190_p7 = scmp.ne.s32.totalorder %s262_s2, %s189_s8  ;;  %p193_p8 = scmp.lt.u32.totalorder %s189_s8, %s262_s2 }
  0x47   :  { %p195_p9 = pnand %p193_p8, %p190_p7 }
  0x49   :  { %198 = shalt.err (!%p195_p9)
}
  0x4a   :  { %122 = dma.vmem_to_hbm [thread:$0]  %s120_s4, 64, %s262_s2, [#allocation4]  }
  0x4b   :  { %203 = dma.done.wait [#allocation4], 64  }
  0x4c   :  { %204 = vsyncadd [#allocation4], 4294967232 }
  0x4d   :  { %126 = vsyncpa [#allocation3], 1 }
  0x4e   :  { %127 = vsyncpa [#allocation6], 1 }
  0x4f   :  { %128 = vsyncpa [#allocation4], 1 }

</bundles_post_ra>
